<compile_context>
chip_gen: v6e
topology: v6e:2x2x1
jax: 0.10.0
libtpu: 0.0.40
codegen_flags: <defaults>
</compile_context>

<pallas_src>
import math

import jax
import jax.numpy as jnp
import numpy as np
from jax.experimental import pallas as pl
from jax.experimental.pallas import tpu as pltpu


# ----------------------------------------------------------------------------
# Pallas kernel: per batch-row-tile   out(BT, p*N) = x(BT, p*K) @ M + b
# ----------------------------------------------------------------------------
def _decoder_kernel(x_ref, m_ref, b_ref, o_ref):
    # x_ref: (BT, p*L*D)  m_ref: (p*L*D, p*l_out*d_out)  b_ref: (1, p*l_out*d_out)
    y = jnp.dot(x_ref[...], m_ref[...], preferred_element_type=jnp.float32)
    o_ref[...] = (y + b_ref[...]).astype(o_ref.dtype)


def _make_restrict_matrix(L, l_output, mode):
    """Pooling matrix R (l_output, L) s.t. restrict(x) == R @ x along seq axis."""
    if not (1 <= l_output <= L):
        raise ValueError(f"l_output={l_output} must be in [1, L={L}]")
    R = np.zeros((l_output, L), dtype=np.float32)
    if mode == "last":
        for k in range(l_output):
            R[k, L - l_output + k] = 1.0
    elif mode == "first":
        for k in range(l_output):
            R[k, k] = 1.0
    elif mode == "sum":
        for k in range(l_output):
            R[k, : L - l_output + k + 1] = 1.0
    elif mode == "pool":
        for k in range(l_output):
            n = L - l_output + k + 1
            R[k, :n] = 1.0 / n
    else:
        raise NotImplementedError(f"mode {mode!r} not supported in kernel")
    return jnp.asarray(R)


def _round_up(x, m):
    return ((x + m - 1) // m) * m


def _choose_row_tile(n_rows, max_rows, sublane=16):
    """Row tile: multiple of `sublane` (bf16 packing), <= max_rows, and small
    enough to give >= 2 grid steps when possible (feeds both v7x TensorCores)."""
    max_rows = max(sublane, (max_rows // sublane) * sublane)
    if n_rows <= sublane:
        return n_rows                                  # single (full) block
    two_step = _round_up(-(-n_rows // 2), sublane)     # ceil(n/2) rounded up
    return min(max_rows, two_step)


# ----------------------------------------------------------------------------
# Parameter fusion (built once, not per forward call)
# ----------------------------------------------------------------------------
def build_sequence_decoder_params(weight, bias, *, l_seq, l_output, mode="pool",
                                  compute_dtype=jnp.bfloat16):
    """Fuse restrict+Linear into M = kron(R^T, W^T) once.

    Returns a dict {p: (M_p, bias_p)} for p in {1, 2}, where p is the number of
    batch rows fused per output row (p=2 -> 128-lane output store)."""
    R = _make_restrict_matrix(l_seq, l_output, mode)                   # (l_out, L)
    # vec(y_b) = vec(x_b) @ kron(R^T, W^T) + tile(b, l_out)
    M = jnp.kron(R.T, weight.astype(jnp.float32).T)                    # (L*D, l_out*d_out)
    b = jnp.tile(bias.astype(jnp.float32), l_output).reshape(1, -1)    # (1, l_out*d_out)
    params = {}
    for p in (1, 2):
        Mp = M if p == 1 else jnp.kron(jnp.eye(p, dtype=jnp.float32), M)
        bp = b if p == 1 else jnp.tile(b, (1, p))
        params[p] = (Mp.astype(compute_dtype), bp)                     # bias stays f32
    return params


# ----------------------------------------------------------------------------
# Forward
# ----------------------------------------------------------------------------
def sequence_decoder_forward(x, params, *, l_output, d_output, squeeze=False,
                             compute_dtype=jnp.bfloat16, batch_tile=4096):
    """x: (B, L, D).  params: output of build_sequence_decoder_params."""
    B, L, D = x.shape
    K = L * D                        # per-row contraction dim (lane-dense)
    N = l_output * d_output          # per-row output width
    out_dtype = x.dtype

    # Pair batch rows when possible -> 128-lane output store (no masked vst).
    p = 2 if (B % 2 == 0 and B >= 2) else 1
    M, b_flat = params[p]
    Kp, Np = p * K, p * N
    n_rows = B // p

    # Free contiguous reshape + compute-dtype cast (bf16 halves the HBM read).
    x2 = x.reshape(n_rows, Kp).astype(compute_dtype)

    tile = _choose_row_tile(n_rows, max(1, batch_tile // p))
    num_steps = -(-n_rows // tile)                     # cdiv; partial tail OK

    x_spec_kwargs = {}
    if num_steps >= 3:
        x_spec_kwargs = dict(pipeline_mode=pl.Buffered(3))   # deeper input pipeline
    in_specs = [
        pl.BlockSpec((tile, Kp), lambda b: (b, 0), **x_spec_kwargs),  # x tile
        pl.BlockSpec((Kp, Np), lambda b: (0, 0)),                     # fused M (resident)
        pl.BlockSpec((1, Np), lambda b: (0, 0)),                      # bias (resident, f32)
    ]

    in_isz = jnp.dtype(compute_dtype).itemsize
    out_isz = jnp.dtype(out_dtype).itemsize
    cost = pl.CostEstimate(
        flops=2 * n_rows * Kp * Np,
        transcendentals=0,
        bytes_accessed=(n_rows * Kp * in_isz + Kp * Np * in_isz
                        + Np * 4 + n_rows * Np * out_isz),
    )

    out2 = pl.pallas_call(
        _decoder_kernel,
        out_shape=jax.ShapeDtypeStruct((n_rows, Np), out_dtype),
        grid_spec=pl.GridSpec(
            grid=(num_steps,),
            in_specs=in_specs,
            out_specs=pl.BlockSpec((tile, Np), lambda b: (b, 0)),
        ),
        compiler_params=pltpu.CompilerParams(
            dimension_semantics=("parallel",),
            vmem_limit_bytes=48 * 1024 * 1024,   # v5e default scoped VMEM is only 16 MiB
        ),
        cost_estimate=cost,
    )(x2, M, b_flat)

    # Row-major memory of (n_rows, p*N) is identical to (B, N): free reshape.
    out = out2.reshape(B, l_output, d_output)
    if squeeze:
        out = out.squeeze(-2)
    return out


# ----------------------------------------------------------------------------
# Pure-JAX reference (mirrors the PyTorch forward exactly)
# ----------------------------------------------------------------------------
def _reference_forward(x, weight, bias, *, l_output, mode="pool"):
    L = x.shape[-2]
    if mode == "last":
        r = x[..., -l_output:, :]
    elif mode == "first":
        r = x[..., :l_output, :]
    elif mode == "sum":
        r = jnp.cumsum(x, axis=-2)[..., -l_output:, :]
    elif mode == "pool":
        denom = jnp.arange(1, L + 1, dtype=x.dtype)[:, None]
        r = (jnp.cumsum(x, axis=-2) / denom)[..., -l_output:, :]
    else:
        raise NotImplementedError
    return r @ weight.T + bias


if __name__ == "__main__":
    D_MODEL, D_OUTPUT, L_OUTPUT, MODE = 32, 16, 4, "pool"

    key = jax.random.PRNGKey(0)
    kw, kb, kx1, kx2, kx3 = jax.random.split(key, 5)

    # Deterministic nn.Linear-style init.
    bound = 1.0 / math.sqrt(D_MODEL)
    weight = jax.random.uniform(kw, (D_OUTPUT, D_MODEL), jnp.float32,
                                minval=-bound, maxval=bound)
    bias = jax.random.uniform(kb, (D_OUTPUT,), jnp.float32,
                              minval=-bound, maxval=bound)

    # --- Case 1: module-sized example (B=2, L=8), f32 compute -> tight check --
    B1, L1 = 2, 8
    x1 = jax.random.normal(kx1, (B1, L1, D_MODEL), dtype=jnp.float32)
    params_f32 = build_sequence_decoder_params(
        weight, bias, l_seq=L1, l_output=L_OUTPUT, mode=MODE,
        compute_dtype=jnp.float32)
    y1 = jax.block_until_ready(
        sequence_decoder_forward(x1, params_f32, l_output=L_OUTPUT,
                                 d_output=D_OUTPUT, compute_dtype=jnp.float32))
    assert y1.shape == (B1, L_OUTPUT, D_OUTPUT), y1.shape
    np.testing.assert_allclose(
        np.asarray(y1),
        np.asarray(_reference_forward(x1, weight, bias,
                                      l_output=L_OUTPUT, mode=MODE)),
        rtol=1e-5, atol=1e-5)

    # --- Case 2: bf16 fast path, paired 128-lane output, multi-step grid with
    #     a partial tail block and a 3-deep input pipeline --------------------
    B2, L2 = 100, 8
    x2 = jax.random.normal(kx2, (B2, L2, D_MODEL), dtype=jnp.float32)
    params_bf16 = build_sequence_decoder_params(
        weight, bias, l_seq=L2, l_output=L_OUTPUT, mode=MODE)   # bf16 default
    y2 = jax.block_until_ready(
        sequence_decoder_forward(x2, params_bf16, l_output=L_OUTPUT,
                                 d_output=D_OUTPUT, batch_tile=32))
    assert y2.shape == (B2, L_OUTPUT, D_OUTPUT), y2.shape
    np.testing.assert_allclose(
        np.asarray(y2),
        np.asarray(_reference_forward(x2, weight, bias,
                                      l_output=L_OUTPUT, mode=MODE)),
        rtol=2e-2, atol=2e-2)

    # --- Case 3: odd batch -> unpaired fallback path --------------------------
    B3, L3 = 5, 8
    x3 = jax.random.normal(kx3, (B3, L3, D_MODEL), dtype=jnp.float32)
    y3 = jax.block_until_ready(
        sequence_decoder_forward(x3, params_bf16, l_output=L_OUTPUT,
                                 d_output=D_OUTPUT))
    assert y3.shape == (B3, L_OUTPUT, D_OUTPUT), y3.shape
    np.testing.assert_allclose(
        np.asarray(y3),
        np.asarray(_reference_forward(x3, weight, bias,
                                      l_output=L_OUTPUT, mode=MODE)),
        rtol=2e-2, atol=2e-2)

    print("KERNEL_OK")
</pallas_src>

<mosaic_0001>
module attributes {stable_mosaic.version = 11 : i64} {
  func.func @_decoder_kernel(%arg0: i32, %arg1: memref<1x512xf32, #tpu.memory_space<vmem>>, %arg2: memref<512x128xf32, #tpu.memory_space<vmem>>, %arg3: memref<1x128xf32, #tpu.memory_space<vmem>>, %arg4: memref<1x128xf32, #tpu.memory_space<vmem>>) attributes {dimension_semantics = [#tpu.dimension_semantics<parallel>], iteration_bounds = array<i64: 1>, scalar_prefetch = 0 : i64, scratch_operands = 0 : i64, tpu.core_type = #tpu.core_type<tc>, window_params = [{transform_indices = @transform_0, window_bounds = array<i64: 1, 512>}, {pipeline_mode = #tpu.pipeline_mode<synchronous>, transform_indices = @transform_1, window_bounds = array<i64: 512, 128>}, {pipeline_mode = #tpu.pipeline_mode<synchronous>, transform_indices = @transform_2, window_bounds = array<i64: 1, 128>}, {transform_indices = @transform_3, window_bounds = array<i64: 1, 128>}]} {
    %c0 = arith.constant 0 : index
    %c0_0 = arith.constant 0 : index
    %0 = vector.load %arg1[%c0, %c0_0] : memref<1x512xf32, #tpu.memory_space<vmem>>, vector<1x512xf32>
    %c0_1 = arith.constant 0 : index
    %c0_2 = arith.constant 0 : index
    %1 = vector.load %arg2[%c0_1, %c0_2] : memref<512x128xf32, #tpu.memory_space<vmem>>, vector<512x128xf32>
    %cst = arith.constant dense<0.000000e+00> : vector<1x128xf32>
    %2 = tpu.matmul %0, %1, %cst {dimension_numbers = #tpu.dot_dimension_numbers<[1], [0], [0], [1], [0, 0, 1, 1], [], []>} : vector<1x512xf32>, vector<512x128xf32>, vector<1x128xf32> -> vector<1x128xf32>
    %c0_3 = arith.constant 0 : index
    %c0_4 = arith.constant 0 : index
    %3 = vector.load %arg3[%c0_3, %c0_4] : memref<1x128xf32, #tpu.memory_space<vmem>>, vector<1x128xf32>
    %4 = arith.addf %2, %3 : vector<1x128xf32>
    %c0_5 = arith.constant 0 : index
    %c0_6 = arith.constant 0 : index
    %5 = vector.load %arg4[%c0_5, %c0_6] : memref<1x128xf32, #tpu.memory_space<vmem>>, vector<1x128xf32>
    tpu.vector_store %arg4[%c0_5, %c0_6], %4 {strides = array<i32>} : memref<1x128xf32, #tpu.memory_space<vmem>>, vector<1x128xf32>,
    return
  }
  func.func @transform_0(%arg0: i32) -> (i32, i32) {
    %c0_i32 = arith.constant 0 : i32
    %c0_i32_0 = arith.constant 0 : i32
    return %arg0, %c0_i32 : i32, i32
  }
  func.func @transform_1(%arg0: i32) -> (i32, i32) {
    %c0_i32 = arith.constant 0 : i32
    %c0_i32_0 = arith.constant 0 : i32
    %c0_i32_1 = arith.constant 0 : i32
    return %c0_i32, %c0_i32_0 : i32, i32
  }
  func.func @transform_2(%arg0: i32) -> (i32, i32) {
    %c0_i32 = arith.constant 0 : i32
    %c0_i32_0 = arith.constant 0 : i32
    %c0_i32_1 = arith.constant 0 : i32
    return %c0_i32, %c0_i32_0 : i32, i32
  }
  func.func @transform_3(%arg0: i32) -> (i32, i32) {
    %c0_i32 = arith.constant 0 : i32
    %c0_i32_0 = arith.constant 0 : i32
    return %arg0, %c0_i32 : i32, i32
  }
}

</mosaic_0001>

<bundles_post_ra>
// kernel: tpu_custom_call.1
= control target key start
LH: loop header
LB: loop body
LE: loop exit
PB: predicated region body
PF: predicated region fallthrough
CT: control target
= control target key end

     0   :  { %8 = vsyncpa [#allocation3], 0  ;;  %s463_s0 = inlined_call_operand.hbm [shape: f32[1,512], index: 0, kind: input, shape index: {}]   ;;  %s464_s1 = inlined_call_operand.hbm [shape: f32[512,128], index: 1, kind: input, shape index: {}]   ;;  %s465_s2 = inlined_call_operand.vmem [shape: f32[1,128], index: 2, kind: input, shape index: {}]   ;;  %s466_s3 = inlined_call_operand.hbm [shape: f32[1,128], index: 3, kind: output, shape index: {}]  }
   0x1   :  { %9 = vsyncpa [#allocation6], 0 }
   0x2   :  { %10 = vsyncpa [#allocation4], 0  ;;  %s426_s12 = smov [#allocation2]   ;;  %s427_s14 = smov [#allocation5]  }
   0x3   :  { %s17_s13 = sshll.u32 %s426_s12, 4  ;;  %s26_s15 = sshll.u32 %s427_s14, 4  ;;  %s18_s13 = int_to_ptr.vmem [resolvable:$true] %s17_s13  ;;  %s27_s15 = int_to_ptr.vmem [resolvable:$true] %s26_s15 }
   0x4   :  { %s368_s16 = scalar_lea.vmem %s18_s13, 64  ;;  %p373_p1 = scmp.lt.s32.totalorder %s18_s13, %s18_s13 }
   0x5   :  { %p369_p0 = scmp.ne.s32.totalorder %s18_s13, %s368_s16  ;;  %p374_p2 = scmp.lt.s32.totalorder %s368_s16, %s368_s16 }
   0x7   :  { %p375_p3 = por %p374_p2, %p373_p1 }
   0x9   :  { %p376_p4 = pnand %p375_p3, %p369_p0 }
   0xb   :  { %379 = shalt.err (!%p376_p4)
}
   0xc   :  { %20 = dma.hbm_to_vmem [thread:$0]  %s463_s0, 64, %s18_s13, [#allocation3]  }
   0xd   :  { %s388_s19 = scalar_lea.vmem %s27_s15, 8192  ;;  %p393_p6 = scmp.lt.s32.totalorder %s27_s15, %s27_s15 }
   0xe   :  { %p389_p5 = scmp.ne.s32.totalorder %s27_s15, %s388_s19  ;;  %p394_p7 = scmp.lt.s32.totalorder %s388_s19, %s388_s19 }
  0x10   :  { %p395_p8 = por %p394_p7, %p393_p6 }
  0x12   :  { %p396_p9 = pnand %p395_p8, %p389_p5 }
  0x14   :  { %399 = shalt.err (!%p396_p9)
}
  0x15   :  { %s428_s20 = smov 128   ;;  %s429_s21 = smov 8  }
  0x16   :  { %32 = dma.hbm_to_vmem [thread:$0]  %s464_s1, 8192, %s27_s15, [#allocation6], %s428_s20, %s428_s20, %s429_s21  }
  0x17   :  { %420 = dma.done.wait [#allocation3], 64  }
  0x18   :  { %421 = vsyncadd [#allocation3], 4294967232 }
  0x19   :  { %422 = dma.done.wait [#allocation6], 8192  }
  0x1a   :  { %423 = vsyncadd [#allocation6], 4294959104  ;;  %v73_v0 = vld [vmem:[#allocation5 + $0xf8] sm:$0xff]  ;;  %v72_v4 = vld [vmem:[#allocation5 + $0xf0] sm:$0xff]  ;;  %v108_v38 = vlaneseq  ;;  %s430_s24 = smov [#allocation7]  }
  0x1b   :  { %v105_v1 = vld [vmem:[#allocation5 + $0x1f8] sm:$0xff]  ;;  %285 = vmatprep.subr.mxu0 %v73_v0  ;;  %v104_v5 = vld [vmem:[#allocation5 + $0x1f0] sm:$0xff]  ;;  %v71_v8 = vld [vmem:[#allocation5 + $0xe8] sm:$0xff]  ;;  %s275_s25 = sshll.u32 %s430_s24, 4  ;;  %s276_s25 = int_to_ptr.vmem [resolvable:$true] %s275_s25 }
  0x1c   :  { %v57_v2 = vld [vmem:[#allocation5 + $0x78] sm:$0xff]  ;;  %320 = vmatprep.subr.mxu1 %v105_v1  ;;  %v56_v6 = vld [vmem:[#allocation5 + $0x70] sm:$0xff]  ;;  %v103_v9 = vld [vmem:[#allocation5 + $0x1e8] sm:$0xff]  ;;  %v109_v47 = vshrl.u32 %v108_v38, 7  ;;  %s400_s26 = scalar_lea.vmem %s276_s25, 16  ;;  %s404_s27 = scalar_lea.vmem %s276_s25, 32 }
  0x1d   :  { %v89_v3 = vld [vmem:[#allocation5 + $0x178] sm:$0xff]  ;;  %286 = vmatpush3.msra.mxu0 %v57_v2  ;;  %v88_v7 = vld [vmem:[#allocation5 + $0x170] sm:$0xff]  ;;  %v55_v10 = vld [vmem:[#allocation5 + $0x68] sm:$0xff]  ;;  %p401_p10 = scmp.ne.s32.totalorder %s276_s25, %s400_s26  ;;  %p405_p11 = scmp.lt.s32.totalorder %s276_s25, %s276_s25 }
  0x1e   :  { %321 = vmatpush3.msra.mxu1 %v89_v3  ;;  %287 = vmatprep.subr.mxu0 %v72_v4  ;;  %v87_v11 = vld [vmem:[#allocation5 + $0x168] sm:$0xff]  ;;  %v70_v12 = vld [vmem:[#allocation5 + $0xe0] sm:$0xff]  ;;  %v69_v16 = vld [vmem:[#allocation5 + $0xd8] sm:$0xff]  ;;  %v114_v56 = vsub.s32 1, %v109_v47  ;;  %v122_v60 = vsub.s32 3, %v109_v47  ;;  %v110_v63 = vsub.s32 0, %v109_v47  ;;  %p406_p12 = scmp.lt.s32.totalorder %s404_s27, %s400_s26 }
  0x1f   :  { %322 = vmatprep.subr.mxu1 %v104_v5  ;;  %288 = vmatpush3.msra.mxu0 %v56_v6  ;;  %v102_v13 = vld [vmem:[#allocation5 + $0x1e0] sm:$0xff]  ;;  %v101_v17 = vld [vmem:[#allocation5 + $0x1d8] sm:$0xff]  ;;  %v68_v20 = vld [vmem:[#allocation5 + $0xd0] sm:$0xff]  ;;  %v118_v0 = vsub.s32 2, %v109_v47 }
  0x20   :  { %323 = vmatpush3.msra.mxu1 %v88_v7  ;;  %289 = vmatprep.subr.mxu0 %v71_v8  ;;  %v54_v14 = vld [vmem:[#allocation5 + $0x60] sm:$0xff]  ;;  %v53_v18 = vld [vmem:[#allocation5 + $0x58] sm:$0xff]  ;;  %v100_v21 = vld [vmem:[#allocation5 + $0x1d0] sm:$0xff]  ;;  %p407_p13 = por %p406_p12, %p405_p11 }
  0x21   :  { %324 = vmatprep.subr.mxu1 %v103_v9  ;;  %v86_v15 = vld [vmem:[#allocation5 + $0x160] sm:$0xff]  ;;  %290 = vmatpush3.msra.mxu0 %v55_v10  ;;  %v85_v19 = vld [vmem:[#allocation5 + $0x158] sm:$0xff]  ;;  %v52_v22 = vld [vmem:[#allocation5 + $0x50] sm:$0xff] }
  0x22   :  { %325 = vmatpush3.msra.mxu1 %v87_v11  ;;  %291 = vmatprep.subr.mxu0 %v70_v12  ;;  %v84_v23 = vld [vmem:[#allocation5 + $0x150] sm:$0xff]  ;;  %v67_v24 = vld [vmem:[#allocation5 + $0xc8] sm:$0xff]  ;;  %v66_v28 = vld [vmem:[#allocation5 + $0xc0] sm:$0xff]  ;;  %p408_p0 = pnand %p407_p13, %p401_p10 }
  0x23   :  { %326 = vmatprep.subr.mxu1 %v102_v13  ;;  %292 = vmatpush3.msra.mxu0 %v54_v14  ;;  %v99_v25 = vld [vmem:[#allocation5 + $0x1c8] sm:$0xff]  ;;  %v98_v29 = vld [vmem:[#allocation5 + $0x1c0] sm:$0xff]  ;;  %v65_v32 = vld [vmem:[#allocation5 + $0xb8] sm:$0xff] }
  0x24   :  { %327 = vmatpush3.msra.mxu1 %v86_v15  ;;  %293 = vmatprep.subr.mxu0 %v69_v16  ;;  %v51_v26 = vld [vmem:[#allocation5 + $0x48] sm:$0xff]  ;;  %v50_v30 = vld [vmem:[#allocation5 + $0x40] sm:$0xff]  ;;  %v97_v33 = vld [vmem:[#allocation5 + $0x1b8] sm:$0xff] }
  0x25   :  { %328 = vmatprep.subr.mxu1 %v101_v17  ;;  %294 = vmatpush3.msra.mxu0 %v53_v18  ;;  %v83_v27 = vld [vmem:[#allocation5 + $0x148] sm:$0xff]  ;;  %v82_v31 = vld [vmem:[#allocation5 + $0x140] sm:$0xff]  ;;  %v49_v34 = vld [vmem:[#allocation5 + $0x38] sm:$0xff] }
  0x26   :  { %329 = vmatpush3.msra.mxu1 %v85_v19  ;;  %295 = vmatprep.subr.mxu0 %v68_v20  ;;  %v81_v35 = vld [vmem:[#allocation5 + $0x138] sm:$0xff]  ;;  %v64_v36 = vld [vmem:[#allocation5 + $0xb0] sm:$0xff]  ;;  %v63_v41 = vld [vmem:[#allocation5 + $0xa8] sm:$0xff] }
  0x27   :  { %330 = vmatprep.subr.mxu1 %v100_v21  ;;  %296 = vmatpush3.msra.mxu0 %v52_v22  ;;  %v96_v37 = vld [vmem:[#allocation5 + $0x1b0] sm:$0xff]  ;;  %v95_v42 = vld [vmem:[#allocation5 + $0x1a8] sm:$0xff]  ;;  %v62_v45 = vld [vmem:[#allocation5 + $0xa0] sm:$0xff] }
  0x28   :  { %331 = vmatpush3.msra.mxu1 %v84_v23  ;;  %297 = vmatprep.subr.mxu0 %v67_v24  ;;  %v48_v39 = vld [vmem:[#allocation5 + $0x30] sm:$0xff]  ;;  %v47_v43 = vld [vmem:[#allocation5 + $0x28] sm:$0xff]  ;;  %v94_v46 = vld [vmem:[#allocation5 + $0x1a0] sm:$0xff] }
  0x29   :  { %332 = vmatprep.subr.mxu1 %v99_v25  ;;  %298 = vmatpush3.msra.mxu0 %v51_v26  ;;  %v80_v40 = vld [vmem:[#allocation5 + $0x130] sm:$0xff]  ;;  %v79_v44 = vld [vmem:[#allocation5 + $0x128] sm:$0xff]  ;;  %v46_v48 = vld [vmem:[#allocation5 + $0x20] sm:$0xff] }
  0x2a   :  { %333 = vmatpush3.msra.mxu1 %v83_v27  ;;  %299 = vmatprep.subr.mxu0 %v66_v28  ;;  %v78_v49 = vld [vmem:[#allocation5 + $0x120] sm:$0xff]  ;;  %v61_v50 = vld [vmem:[#allocation5 + $0x98] sm:$0xff]  ;;  %v60_v54 = vld [vmem:[#allocation5 + $0x90] sm:$0xff] }
  0x2b   :  { %334 = vmatprep.subr.mxu1 %v98_v29  ;;  %300 = vmatpush3.msra.mxu0 %v50_v30  ;;  %v93_v51 = vld [vmem:[#allocation5 + $0x198] sm:$0xff]  ;;  %v92_v55 = vld [vmem:[#allocation5 + $0x190] sm:$0xff]  ;;  %v59_v61 = vld [vmem:[#allocation5 + $0x88] sm:$0xff] }
  0x2c   :  { %335 = vmatpush3.msra.mxu1 %v82_v31  ;;  %301 = vmatprep.subr.mxu0 %v65_v32  ;;  %v45_v52 = vld [vmem:[#allocation5 + $0x18] sm:$0xff]  ;;  %v44_v57 = vld [vmem:[#allocation5 + $0x10] sm:$0xff]  ;;  %v91_v62 = vld [vmem:[#allocation5 + $0x188] sm:$0xff] }
  0x2d   :  { %336 = vmatprep.subr.mxu1 %v97_v33  ;;  %302 = vmatpush3.msra.mxu0 %v49_v34  ;;  %v77_v53 = vld [vmem:[#allocation5 + $0x118] sm:$0xff]  ;;  %v76_v58 = vld [vmem:[#allocation5 + $0x110] sm:$0xff]  ;;  %v43_v1 = vld [vmem:[#allocation5 + $0x8] sm:$0xff] }
  0x2e   :  { %337 = vmatpush3.msra.mxu1 %v81_v35  ;;  %303 = vmatprep.subr.mxu0 %v64_v36  ;;  %v41_v59 = vld [vmem:[#allocation2] sm:$0xf]  ;;  %v75_v2 = vld [vmem:[#allocation5 + $0x108] sm:$0xff]  ;;  %v58_v3 = vld [vmem:[#allocation5 + $0x80] sm:$0xff] }
  0x2f   :  { %338 = vmatprep.subr.mxu1 %v96_v37  ;;  %304 = vmatpush3.msra.mxu0 %v48_v39  ;;  %v90_v4 = vld [vmem:[#allocation5 + $0x180] sm:$0xff]  ;;  %v115_v5 = vrot.slane %v41_v59, %v114_v56  ;;  %v123_v7 = vrot.slane %v41_v59, %v122_v60  ;;  %v111_v9 = vrot.slane %v41_v59, %v110_v63  ;;  %v106_v13 = vld [vmem:[%s465_s2] sm:$0x1] }
  0x30   :  { %339 = vmatpush3.msra.mxu1 %v80_v40  ;;  %305 = vmatprep.subr.mxu0 %v63_v41  ;;  %v42_v6 = vld [vmem:[#allocation5] sm:$0xff]  ;;  %v119_v10 = vrot.slane %v41_v59, %v118_v0 }
  0x31   :  { %340 = vmatprep.subr.mxu1 %v95_v42  ;;  %306 = vmatpush3.msra.mxu0 %v47_v43  ;;  %v74_v8 = vld [vmem:[#allocation5 + $0x100] sm:$0xff] }
  0x32   :  { %341 = vmatpush3.msra.mxu1 %v79_v44  ;;  %307 = vmatprep.subr.mxu0 %v62_v45 }
  0x33   :  { %342 = vmatprep.subr.mxu1 %v94_v46  ;;  %308 = vmatpush3.msra.mxu0 %v46_v48 }
  0x34   :  { %343 = vmatpush3.msra.mxu1 %v78_v49  ;;  %309 = vmatprep.subr.mxu0 %v61_v50 }
  0x35   :  { %344 = vmatprep.subr.mxu1 %v93_v51  ;;  %310 = vmatpush3.msra.mxu0 %v45_v52 }
  0x36   :  { %345 = vmatpush3.msra.mxu1 %v77_v53  ;;  %311 = vmatprep.subr.mxu0 %v60_v54 }
  0x37   :  { %346 = vmatprep.subr.mxu1 %v92_v55  ;;  %312 = vmatpush3.msra.mxu0 %v44_v57 }
  0x38   :  { %347 = vmatpush3.msra.mxu1 %v76_v58  ;;  %313 = vmatprep.subr.mxu0 %v59_v61 }
  0x39   :  { %348 = vmatprep.subr.mxu1 %v91_v62  ;;  %314 = vmatpush3.msra.mxu0 %v43_v1 }
  0x3a   :  { %349 = vmatpush3.msra.mxu1 %v75_v2  ;;  %315 = vmatprep.subr.mxu0 %v58_v3 }
  0x3b   :  { %350 = vmatprep.subr.mxu1 %v90_v4  ;;  %316 = vmatpush3.msra.mxu0 %v42_v6 }
  0x3c   :  { %192 = vmatprep.mubr.f32.mxu0 %v115_v5  ;;  %351 = vmatpush3.msra.mxu1 %v74_v8 }
  0x3d   :  { %262 = vmatprep.mubr.f32.mxu1 %v123_v7  ;;  %193 = vmatmul.mubr.f32.vlgmr.msra.gmra.mxu0 %v111_v9 }
  0x3e   :  { %263 = vmatmul.mubr.f32.vlgmr.msra.gmra.mxu1 %v119_v10 }
  0xfd   :  { %v317_v11 = vpop.f32.mrf.mxu0 }
  0xfe   :  { %v352_v12 = vpop.f32.mrf.mxu1 }
  0xff   :  { %v318_v14 = vpop.f32.mrf.mxu0 }
 0x100   :  { %v353_v15 = vpop.f32.mrf.mxu1  ;;  %v319_v16 = vadd.f32 %v318_v14, %v317_v11 }
 0x101   :  { %v354_v18 = vadd.f32 %v353_v15, %v352_v12 }
 0x102   :  { %v195_v17 = vadd.f32 %v319_v16, %v106_v13 }
 0x104   :  { %v265_v19 = vadd.f32 %v354_v18, %v195_v17 }
 0x106   :  { %268 = vst [vmem:[#allocation7] sm:$0x1] %v265_v19 }
 0x107   :  { %411 = shalt.err (!%p408_p0)
}
 0x108   :  { %278 = dma.vmem_to_hbm [thread:$0]  %s276_s25, 16, %s466_s3, [#allocation4]  }
 0x109   :  { %424 = dma.done.wait [#allocation4], 16  }
 0x10a   :  { %425 = vsyncadd [#allocation4], 4294967280 }
 0x10b   :  { %282 = vsyncpa [#allocation3], 1 }
 0x10c   :  { %283 = vsyncpa [#allocation6], 1 }
 0x10d   :  { %284 = vsyncpa [#allocation4], 1 }

</bundles_post_ra>
